<compile_context>
chip_gen: v7x
topology: tpu7x:2x2x1
jax: 0.10.0
libtpu: 0.0.40
codegen_flags: <defaults>
</compile_context>

<pallas_src>
import functools

import jax
import jax.numpy as jnp
from jax.experimental import pallas as pl
from jax.experimental.pallas import tpu as pltpu


def self_attention_kernel(x_ref, w_ref, b_ref, o_ref, *, emb_size):
    """One grid step handles a block of `bt` batch elements.

    x_ref : (bt, S, D_in)  activations, f32
    w_ref : (D_in, 3E)     fused [Wq*scale | Wk | Wv], bf16
    b_ref : (1, 3E)        fused [bq*scale | bk | bv], f32
    o_ref : (bt, S, E)     output, f32
    """
    bt, S, d_in = x_ref.shape
    E = emb_size

    # ---- fused QKV projection: one wide MXU matmul (bf16 in, f32 acc) -----
    # (bt, S, D_in) -> (bt*S, D_in) is a layout-trivial sublane merge.
    x = x_ref[...].reshape(bt * S, d_in).astype(jnp.bfloat16)
    qkv = jnp.dot(x, w_ref[...], preferred_element_type=jnp.float32)
    qkv = (qkv + b_ref[...]).reshape(bt, S, 3 * E)

    q = qkv[:, :, :E]          # 1/sqrt(E) scale already folded into Wq / bq
    k = qkv[:, :, E:2 * E]
    v = qkv[:, :, 2 * E:]

    # ---- scores: contract last dims directly (no k.T / XLU transpose) -----
    scores = jnp.einsum(
        "bqd,bkd->bqk",
        q.astype(jnp.bfloat16), k.astype(jnp.bfloat16),
        preferred_element_type=jnp.float32)                 # (bt, S, S) f32

    # ---- numerically stable softmax, kept in f32 (VPU + EUP) --------------
    m = jnp.max(scores, axis=-1, keepdims=True)
    e = jnp.exp(scores - m)
    denom = jnp.sum(e, axis=-1, keepdims=True)
    attn = e * pl.reciprocal(denom, approx=True)
    # TODO(synk): the torch module also caches self.attention_weights as a
    # side effect; expose `attn` as a second kernel output if that is needed.

    # ---- attention-weighted values -----------------------------------------
    out = jnp.einsum(
        "bqk,bkd->bqd",
        attn.astype(jnp.bfloat16), v.astype(jnp.bfloat16),
        preferred_element_type=jnp.float32)                 # (bt, S, E) f32

    o_ref[...] = out.astype(o_ref.dtype)


def prepare_params(params, emb_size):
    """Fuse Wq/Wk/Wv -> (D_in, 3E) bf16, fold the 1/sqrt(E) scale into the
    query weight AND bias (softmax(scale*(xWq+bq) @ K^T) == reference)."""
    scale = float(emb_size) ** (-0.5)
    w_qkv = jnp.concatenate(
        [params["wq"] * scale, params["wk"], params["wv"]], axis=1)
    b_qkv = jnp.concatenate(
        [params["bq"] * scale, params["bk"], params["bv"]], axis=1)
    return w_qkv.astype(jnp.bfloat16), b_qkv.astype(jnp.float32)


def self_attention(x, params, emb_size, *, batch_block=None, target_rows=256):
    """x: (B, S, D_in) f32 -> (B, S, E) f32."""
    B, S, D_in = x.shape
    E = emb_size

    w_qkv, b_qkv = prepare_params(params, E)

    # Choose how many batch elements each grid step processes so the fused
    # projection sees ~target_rows rows of M (fills MXU / amortizes the
    # ~0.35us per-grid-step pipeline overhead).  Must divide B.
    if batch_block is None:
        bt = max(1, min(B, target_rows // max(S, 1)))
        while B % bt:
            bt -= 1
    else:
        bt = batch_block
    assert B % bt == 0, "batch_block must divide B"
    grid = (B // bt,)

    kernel = functools.partial(self_attention_kernel, emb_size=E)

    return pl.pallas_call(
        kernel,
        out_shape=jax.ShapeDtypeStruct((B, S, E), jnp.float32),
        grid_spec=pltpu.PrefetchScalarGridSpec(
            num_scalar_prefetch=0,
            grid=grid,
            in_specs=[
                pl.BlockSpec((bt, S, D_in), lambda i: (i, 0, 0)),   # x block
                pl.BlockSpec((D_in, 3 * E), lambda i: (0, 0)),      # fused W
                pl.BlockSpec((1, 3 * E), lambda i: (0, 0)),         # fused b
            ],
            out_specs=pl.BlockSpec((bt, S, E), lambda i: (i, 0, 0)),
        ),
        compiler_params=pltpu.CompilerParams(
            dimension_semantics=("parallel",),     # batch axis -> 2 TCs on v7x
            vmem_limit_bytes=32 * 1024 * 1024,     # explicit scoped-VMEM limit
        ),
    )(x, w_qkv, b_qkv)


def init_params(key, input_dim, emb_size):
    """Deterministic init; shapes match nn.Linear(input_dim, emb_size) but
    weights are stored transposed as (input_dim, emb_size)."""
    ks = jax.random.split(key, 8)
    bound = 1.0 / (input_dim ** 0.5)

    def lin(kw, kb):
        w = jax.random.uniform(kw, (input_dim, emb_size), jnp.float32, -bound, bound)
        b = jax.random.uniform(kb, (1, emb_size), jnp.float32, -bound, bound)
        return w, b

    wq, bq = lin(ks[0], ks[1])
    wk, bk = lin(ks[2], ks[3])
    wv, bv = lin(ks[4], ks[5])
    # linear_o1 exists in the torch __init__ but is unused in forward();
    # keep the parameters for parity only.
    wo = jax.random.uniform(ks[6], (emb_size, emb_size), jnp.float32, -bound, bound)
    bo = jax.random.uniform(ks[7], (1, emb_size), jnp.float32, -bound, bound)
    return {"wq": wq, "bq": bq, "wk": wk, "bk": bk, "wv": wv, "bv": bv,
            "wo": wo, "bo": bo}


def reference(x, params, emb_size):
    """Pure-JAX f32 reference matching the torch forward()."""
    scale = float(emb_size) ** (-0.5)
    q = x @ params["wq"] + params["bq"]
    k = x @ params["wk"] + params["bk"]
    v = x @ params["wv"] + params["bv"]
    scores = jnp.einsum("bsd,btd->bst", q, k) * scale
    attn = jax.nn.softmax(scores, axis=-1)
    return jnp.einsum("bst,btd->bsd", attn, v)


if __name__ == "__main__":
    B, S, D_in, E = 2, 8, 32, 32
    key = jax.random.PRNGKey(0)
    kx, kp = jax.random.split(key)
    x = jax.random.normal(kx, (B, S, D_in), jnp.float32)
    params = init_params(kp, D_in, E)

    out = self_attention(x, params, E)
    out = jax.block_until_ready(out)

    ref = reference(x, params, E)
    assert out.shape == (B, S, E)
    # bf16 MXU inputs (f32 accumulation) + approx reciprocal => relaxed tol.
    max_err = float(jnp.max(jnp.abs(out - ref)))
    assert jnp.allclose(out, ref, atol=3e-2, rtol=3e-2), \
        f"mismatch vs reference (max |err| = {max_err})"
    print("KERNEL_OK")
</pallas_src>

<mosaic_0001>
module attributes {stable_mosaic.version = 11 : i64} {
  func.func @self_attention_kernel(%arg0: i32, %arg1: memref<2x8x32xf32, #tpu.memory_space<vmem>>, %arg2: memref<32x96xbf16, #tpu.memory_space<vmem>>, %arg3: memref<1x96xf32, #tpu.memory_space<vmem>>, %arg4: memref<2x8x32xf32, #tpu.memory_space<vmem>>) attributes {dimension_semantics = [#tpu.dimension_semantics<parallel>], iteration_bounds = array<i64: 1>, scalar_prefetch = 0 : i64, scratch_operands = 0 : i64, tpu.core_type = #tpu.core_type<tc>, window_params = [{transform_indices = @transform_0, window_bounds = array<i64: 2, 8, 32>}, {pipeline_mode = #tpu.pipeline_mode<synchronous>, transform_indices = @transform_1, window_bounds = array<i64: 32, 96>}, {pipeline_mode = #tpu.pipeline_mode<synchronous>, transform_indices = @transform_2, window_bounds = array<i64: 1, 96>}, {transform_indices = @transform_3, window_bounds = array<i64: 2, 8, 32>}]} {
    %c0 = arith.constant 0 : index
    %c0_0 = arith.constant 0 : index
    %c0_1 = arith.constant 0 : index
    %0 = vector.load %arg1[%c0, %c0_0, %c0_1] : memref<2x8x32xf32, #tpu.memory_space<vmem>>, vector<2x8x32xf32>
    %1 = vector.shape_cast %0 : vector<2x8x32xf32> to vector<16x32xf32>
    %2 = arith.truncf %1 : vector<16x32xf32> to vector<16x32xbf16>
    %c0_2 = arith.constant 0 : index
    %c0_3 = arith.constant 0 : index
    %3 = vector.load %arg2[%c0_2, %c0_3] : memref<32x96xbf16, #tpu.memory_space<vmem>>, vector<32x96xbf16>
    %cst = arith.constant dense<0.000000e+00> : vector<16x96xf32>
    %4 = tpu.matmul %2, %3, %cst {dimension_numbers = #tpu.dot_dimension_numbers<[1], [0], [0], [1], [0, 0, 1, 1], [], []>} : vector<16x32xbf16>, vector<32x96xbf16>, vector<16x96xf32> -> vector<16x96xf32>
    %c0_4 = arith.constant 0 : index
    %c0_5 = arith.constant 0 : index
    %5 = vector.load %arg3[%c0_4, %c0_5] : memref<1x96xf32, #tpu.memory_space<vmem>>, vector<1x96xf32>
    %6 = vector.broadcast %5 : vector<1x96xf32> to vector<16x96xf32>
    %7 = arith.addf %4, %6 : vector<16x96xf32>
    %8 = vector.shape_cast %7 : vector<16x96xf32> to vector<2x8x96xf32>
    %9 = vector.extract_strided_slice %8 {offsets = [0, 0, 0], sizes = [2, 8, 32], strides = [1, 1, 1]} : vector<2x8x96xf32> to vector<2x8x32xf32>
    %10 = vector.extract_strided_slice %8 {offsets = [0, 0, 32], sizes = [2, 8, 32], strides = [1, 1, 1]} : vector<2x8x96xf32> to vector<2x8x32xf32>
    %11 = vector.extract_strided_slice %8 {offsets = [0, 0, 64], sizes = [2, 8, 32], strides = [1, 1, 1]} : vector<2x8x96xf32> to vector<2x8x32xf32>
    %12 = arith.truncf %9 : vector<2x8x32xf32> to vector<2x8x32xbf16>
    %13 = arith.truncf %10 : vector<2x8x32xf32> to vector<2x8x32xbf16>
    "tpu.trace_start"() <{level = 10 : i32, message = "bqd,bkd->bqk"}> : () -> ()
    %cst_6 = arith.constant dense<0.000000e+00> : vector<2x8x8xf32>
    %14 = tpu.matmul %12, %13, %cst_6 {dimension_numbers = #tpu.dot_dimension_numbers<[2], [2], [1], [1], [0, 0, 0, 1, 1, 1], [0], [0]>} : vector<2x8x32xbf16>, vector<2x8x32xbf16>, vector<2x8x8xf32> -> vector<2x8x8xf32>
    "tpu.trace_stop"() : () -> ()
    %cst_7 = arith.constant dense<0xFF800000> : vector<2x8xf32>
    %15 = vector.multi_reduction <maximumf>, %14, %cst_7 [2] : vector<2x8x8xf32> to vector<2x8xf32>
    %16 = vector.shape_cast %15 : vector<2x8xf32> to vector<2x8x1xf32>
    %17 = vector.broadcast %16 : vector<2x8x1xf32> to vector<2x8x8xf32>
    %18 = arith.subf %14, %17 : vector<2x8x8xf32>
    %19 = math.exp %18 : vector<2x8x8xf32>
    %cst_8 = arith.constant dense<0.000000e+00> : vector<2x8xf32>
    %20 = vector.multi_reduction <add>, %19, %cst_8 [2] : vector<2x8x8xf32> to vector<2x8xf32>
    %21 = vector.shape_cast %20 : vector<2x8xf32> to vector<2x8x1xf32>
    %22 = tpu.reciprocal %21 {approx = true} : vector<2x8x1xf32> -> vector<2x8x1xf32>
    %23 = vector.broadcast %22 : vector<2x8x1xf32> to vector<2x8x8xf32>
    %24 = arith.mulf %19, %23 : vector<2x8x8xf32>
    %25 = arith.truncf %24 : vector<2x8x8xf32> to vector<2x8x8xbf16>
    %26 = arith.truncf %11 : vector<2x8x32xf32> to vector<2x8x32xbf16>
    "tpu.trace_start"() <{level = 10 : i32, message = "bqk,bkd->bqd"}> : () -> ()
    %cst_9 = arith.constant dense<0.000000e+00> : vector<2x8x32xf32>
    %27 = tpu.matmul %25, %26, %cst_9 {dimension_numbers = #tpu.dot_dimension_numbers<[2], [1], [1], [2], [0, 0, 0, 1, 1, 2], [0], [0]>} : vector<2x8x8xbf16>, vector<2x8x32xbf16>, vector<2x8x32xf32> -> vector<2x8x32xf32>
    "tpu.trace_stop"() : () -> ()
    %c0_10 = arith.constant 0 : index
    %c0_11 = arith.constant 0 : index
    %c0_12 = arith.constant 0 : index
    %28 = vector.load %arg4[%c0_10, %c0_11, %c0_12] : memref<2x8x32xf32, #tpu.memory_space<vmem>>, vector<2x8x32xf32>
    tpu.vector_store %arg4[%c0_10, %c0_11, %c0_12], %27 {strides = array<i32>} : memref<2x8x32xf32, #tpu.memory_space<vmem>>, vector<2x8x32xf32>,
    return
  }
  func.func @transform_0(%arg0: i32) -> (i32, i32, i32) {
    %c0_i32 = arith.constant 0 : i32
    %c0_i32_0 = arith.constant 0 : i32
    %c0_i32_1 = arith.constant 0 : i32
    return %arg0, %c0_i32, %c0_i32_0 : i32, i32, i32
  }
  func.func @transform_1(%arg0: i32) -> (i32, i32) {
    %c0_i32 = arith.constant 0 : i32
    %c0_i32_0 = arith.constant 0 : i32
    %c0_i32_1 = arith.constant 0 : i32
    return %c0_i32, %c0_i32_0 : i32, i32
  }
  func.func @transform_2(%arg0: i32) -> (i32, i32) {
    %c0_i32 = arith.constant 0 : i32
    %c0_i32_0 = arith.constant 0 : i32
    %c0_i32_1 = arith.constant 0 : i32
    return %c0_i32, %c0_i32_0 : i32, i32
  }
  func.func @transform_3(%arg0: i32) -> (i32, i32, i32) {
    %c0_i32 = arith.constant 0 : i32
    %c0_i32_0 = arith.constant 0 : i32
    %c0_i32_1 = arith.constant 0 : i32
    return %arg0, %c0_i32, %c0_i32_0 : i32, i32, i32
  }
}

</mosaic_0001>

<bundles_post_ra>
// kernel: tpu_custom_call.1
= control target key start
LH: loop header
LB: loop body
LE: loop exit
PB: predicated region body
PF: predicated region fallthrough
CT: control target
= control target key end

     0   :  { %8 = vsyncpa [#allocation3], 0  ;;  %s599_s0 = inlined_call_operand.hbm [shape: f32[2,8,32], index: 0, kind: input, shape index: {}]   ;;  %s600_s1 = inlined_call_operand.hbm [shape: bf16[32,96], index: 1, kind: input, shape index: {}]   ;;  %s601_s2 = inlined_call_operand.vmem [shape: f32[1,96], index: 2, kind: input, shape index: {}]   ;;  %s602_s3 = inlined_call_operand.hbm [shape: f32[2,8,32], index: 3, kind: output, shape index: {}]  }
   0x1   :  { %9 = vsyncpa [#allocation6], 0 }
   0x2   :  { %10 = vsyncpa [#allocation4], 0  ;;  %s500_s12 = smov [#allocation2]   ;;  %s428_s16 = scalar_lea.hbm %s599_s0, 256 }
   0x3   :  { %s16_s13 = sshll.u32 %s500_s12, 4  ;;  %p429_p0 = scmp.ne.s32.totalorder %s599_s0, %s428_s16  ;;  %s17_s13 = int_to_ptr.vmem [resolvable:$true] %s16_s13 }
   0x4   :  { %p432_p1 = scmp.lt.u32.totalorder %s428_s16, %s599_s0 }
   0x6   :  { %p434_p2 = pnand %p432_p1, %p429_p0 }
   0x8   :  { %437 = shalt.err (!%p434_p2)
}
   0x9   :  { %s438_s21 = scalar_lea.vmem %s17_s13, 256  ;;  %p443_p4 = scmp.lt.s32.totalorder %s17_s13, %s17_s13 }
   0xa   :  { %p439_p3 = scmp.ne.s32.totalorder %s17_s13, %s438_s21  ;;  %p444_p5 = scmp.lt.s32.totalorder %s438_s21, %s438_s21 }
   0xc   :  { %p445_p6 = por %p444_p5, %p443_p4 }
   0xe   :  { %p446_p7 = pnand %p445_p6, %p439_p3 }
  0x10   :  { %449 = shalt.err (!%p446_p7)
}
  0x11   :  { %s501_s22 = smov 128   ;;  %s502_s23 = smov 8  }
  0x12   :  { %22 = dma.hbm_to_vmem [thread:$0]  %s599_s0, 256, %s17_s13, [#allocation3], %s501_s22, %s501_s22, %s502_s23  }
  0x13   :  { %s503_s26 = smov [#allocation5]   ;;  %s450_s30 = scalar_lea.hbm %s600_s1, 256 }
  0x14   :  { %s28_s27 = sshll.u32 %s503_s26, 4  ;;  %p451_p8 = scmp.ne.s32.totalorder %s600_s1, %s450_s30  ;;  %s29_s27 = int_to_ptr.vmem [resolvable:$true] %s28_s27 }
  0x15   :  { %p454_p9 = scmp.lt.u32.totalorder %s450_s30, %s600_s1 }
  0x17   :  { %p456_p10 = pnand %p454_p9, %p451_p8 }
  0x19   :  { %459 = shalt.err (!%p456_p10)
}
  0x1a   :  { %s460_s8 = scalar_lea.vmem %s29_s27, 256  ;;  %p465_p12 = scmp.lt.s32.totalorder %s29_s27, %s29_s27 }
  0x1b   :  { %p461_p11 = scmp.ne.s32.totalorder %s29_s27, %s460_s8  ;;  %p466_p13 = scmp.lt.s32.totalorder %s460_s8, %s460_s8 }
  0x1d   :  { %p467_p0 = por %p466_p13, %p465_p12 }
  0x1f   :  { %p468_p1 = pnand %p467_p0, %p461_p11 }
  0x21   :  { %471 = shalt.err (!%p468_p1)
}
  0x22   :  { %s504_s0 = smov 64   ;;  %s505_s9 = smov 4  }
  0x23   :  { %34 = dma.hbm_to_vmem [thread:$0]  %s600_s1, 256, %s29_s27, [#allocation6], %s504_s0, %s504_s0, %s505_s9  }
  0x24   :  { %494 = dma.done.wait [#allocation3], 256  }
  0x25   :  { %495 = vsyncadd [#allocation3], 4294967040 }
  0x26   :  { %496 = dma.done.wait [#allocation6], 256  }
  0x27   :  { %497 = vsyncadd [#allocation6], 4294967040  ;;  %v506_v0 = vmov 0.0   ;;  %vm507_vm0 = vmmov 0   ;;  %v418_v1 = vld [vmem:[#allocation5] sm:$0xff]   ;;  %v419_v2 = vld [vmem:[#allocation5 + $0x8] sm:$0xff]  }
  0x28   :  { %376 = vmatprep.subr.bf16.mxu0 %v506_v0  ;;  %380 = vmatprep.mubr.msk.bf16.mxu0 %vm507_vm0, %v506_v0  ;;  %v44_v3 = vld [vmem:[#allocation2] sm:$0xff]  ;;  %v45_v4 = vld [vmem:[#allocation2 + $0x8] sm:$0xff]  ;;  %vm70_vm1 = vcmask 261120   ;;  %s508_s13 = smov 96   ;;  %vm215_vm2 = vcmask 64512   ;;  %vm245_vm3 = vcmask 1043456  }
  0x29   :  { %384 = vmatprep.subr.bf16.mxu1 %v506_v0  ;;  %386 = vmatprep.mubr.msk.bf16.mxu1 %vm507_vm0, %v506_v0  ;;  %v46_v5 = vpack.c.bf16 %v45_v4, %v44_v3  ;;  %v357_v6 = vld [vmem:[%s601_s2] ss:$0 sm:$0xff]  ;;  %s509_s2 = smov [#allocation7]  }
  0x2a   :  { %377 = vmatpush3.bf16.msra.mxu0 %v418_v1  ;;  %s344_s14 = sshll.u32 %s509_s2, 4  ;;  %s345_s14 = int_to_ptr.vmem [resolvable:$true] %s344_s14 }
  0x2b   :  { %378 = vmatprep.subr.bf16.mxu0 %v506_v0  ;;  %s472_s15 = scalar_lea.vmem %s345_s14, 256  ;;  %p477_p3 = scmp.lt.s32.totalorder %s345_s14, %s345_s14 }
  0x2c   :  { %p473_p2 = scmp.ne.s32.totalorder %s345_s14, %s472_s15  ;;  %p478_p4 = scmp.lt.s32.totalorder %s472_s15, %s472_s15 }
  0x2e   :  { %379 = vmatpush3.bf16.msra.mxu0 %v419_v2  ;;  %p479_p5 = por %p478_p4, %p477_p3 }
  0x2f   :  { %390 = vmatprep.subr.bf16.mxu0 %v506_v0 }
  0x30   :  { %p480_p6 = pnand %p479_p5, %p473_p2 }
  0x31   :  { %381 = vmatmul.mubr.msk.bf16.vlgmr.msra.gmra.mrb[0].mxu0 %vm70_vm1, %v46_v5 }
  0x32   :  { %392 = vmatprep.mubr.msk.bf16.mxu0 %vm507_vm0, %v506_v0 }
 0x104   :  { %v108_v7 = vpop.f32.mrb[0].mxu0 }
 0x105   :  { %v109_v8 = vadd.f32 %v357_v6, %v108_v7  ;;  %v382_v9 = vpop.f32.mrb[1].mxu0 }
 0x106   :  { %v111_v10 = vpop.f32.mrb[2].mxu0 }
 0x107   :  { %v115_v11 = vpack.c.bf16 %v109_v8, %v109_v8  ;;  %v112_v12 = vadd.f32 %v357_v6, %v111_v10  ;;  %v383_v13 = vpop.f32.mrb[3].mxu0 }
 0x109   :  { %118 = vrot.lane.b32.xlu0 %v115_v11, %s508_s13  ;;  %v116_v14 = vpack.c.bf16 %v112_v12, %v112_v12 }
 0x10d   :  { %167 = vrot.lane.b32.xlu0 %v116_v14, %s508_s13 }
 0x17b   :  { %v119_v15 = vpop.permute.xlu0 %118 }
 0x17c   :  { %v124_v16 = vsel %vm70_vm1, %v119_v15, 0 }
 0x17d   :  { %385 = vmatpush3.bf16.xpose.msra.mxu1 %v124_v16 }
 0x17e   :  { %396 = vmatprep.subr.bf16.mxu1 %v506_v0 }
 0x17f   :  { %v168_v17 = vpop.permute.xlu0 %167 }
 0x180   :  { %v173_v18 = vsel %vm70_vm1, %v168_v17, 0 }
 0x181   :  { %391 = vmatpush3.bf16.xpose.msra.mxu0 %v173_v18 }
 0x182   :  { %402 = vmatprep.subr.bf16.mxu0 %v506_v0 }
 0x184   :  { %387 = vmatmul.mubr.msk.bf16.vlgmr.msra.gmra.mrb[0].mxu1 %vm70_vm1, %v115_v11 }
 0x185   :  { %398 = vmatprep.mubr.msk.bf16.mxu1 %vm507_vm0, %v506_v0 }
 0x188   :  { %393 = vmatmul.mubr.msk.bf16.vlgmr.msra.gmra.mrb[4].mxu0 %vm70_vm1, %v116_v14 }
 0x189   :  { %404 = vmatprep.mubr.msk.bf16.mxu0 %vm507_vm0, %v506_v0 }
 0x257   :  { %v160_v19 = vpop.f32.mrb[0].mxu1 }
 0x258   :  { %v388_v20 = vpop.f32.mrb[1].mxu1  ;;  %v216_v21 = vsel %vm215_vm2, %v160_v19, -inf }
 0x259   :  { %217 = vmax.xlane.f32.xlu1 %v216_v21  ;;  %v163_v22 = vpop.f32.mrb[2].mxu1 }
 0x25a   :  { %v389_v23 = vpop.f32.mrb[3].mxu1 }
 0x25b   :  { %v209_v24 = vpop.f32.mrb[4].mxu0 }
 0x25c   :  { %v394_v25 = vpop.f32.mrb[5].mxu0  ;;  %v219_v26 = vsel %vm215_vm2, %v209_v24, -inf }
 0x25d   :  { %220 = vmax.xlane.f32.xlu1 %v219_v26  ;;  %v212_v27 = vpop.f32.mrb[6].mxu0 }
 0x25e   :  { %v395_v28 = vpop.f32.mrb[7].mxu0 }
 0x26e   :  { %240 = vrot.lane.b32.xlu1 %v115_v11, %s504_s0 }
 0x2e6   :  { %v218_v29 = vpop.xlane.xlu1 %217 }
 0x2e7   :  { %v222_v30 = vsub.f32 %v160_v19, %v218_v29 }
 0x2e9   :  { %v224_v31 = vmul.f32 1.442695, %v222_v30 }
 0x2ea   :  { %v221_v32 = vpop.xlane.xlu1 %220 }
 0x2eb   :  { %420 = vpow2.f32 %v224_v31  ;;  %v223_v33 = vsub.f32 %v209_v24, %v221_v32 }
 0x2ed   :  { %v226_v34 = vmul.f32 1.442695, %v223_v33 }
 0x2ee   :  { %v241_v35 = vpop.permute.xlu1 %240 }
 0x2ef   :  { %422 = vpow2.f32 %v226_v34  ;;  %v247_v36 = vsel %vm245_vm3, %v241_v35, 0 }
 0x2f0   :  { %397 = vmatpush3.bf16.msra.mxu1 %v247_v36 }
 0x2f5   :  { %v421_v37 = vpop.eup %420 }
 0x2f6   :  { %v228_v38 = vsel %vm215_vm2, %v421_v37, 0.0 }
 0x2f7   :  { %229 = vadd.xlane.f32.xlu0 %v228_v38 }
 0x2f9   :  { %v423_v39 = vpop.eup %422 }
 0x2fa   :  { %v231_v40 = vsel %vm215_vm2, %v423_v39, 0.0 }
 0x2fb   :  { %232 = vadd.xlane.f32.xlu1 %v231_v40 }
 0x30c   :  { %289 = vrot.lane.b32.xlu1 %v116_v14, %s504_s0 }
 0x384   :  { %v230_v41 = vpop.xlane.xlu0 %229 }
 0x385   :  { %424 = vrcp.f32 %v230_v41 }
 0x388   :  { %v233_v42 = vpop.xlane.xlu1 %232 }
 0x389   :  { %426 = vrcp.f32 %v233_v42 }
 0x38c   :  { %v290_v43 = vpop.permute.xlu1 %289 }
 0x38d   :  { %v295_v44 = vsel %vm245_vm3, %v290_v43, 0 }
 0x38e   :  { %403 = vmatpush3.bf16.msra.mxu0 %v295_v44 }
 0x38f   :  { %v425_v45 = vpop.eup %424 }
 0x390   :  { %v236_v46 = vmul.f32 %v425_v45, %v421_v37 }
 0x392   :  { %v238_v47 = vpack.c.bf16 %v236_v46, %v236_v46 }
 0x393   :  { %v427_v48 = vpop.eup %426 }
 0x394   :  { %v237_v49 = vmul.f32 %v427_v48, %v423_v39  ;;  %399 = vmatmul.mubr.msk.bf16.vlgmr.msra.gmra.mrb[4].mxu1 %vm215_vm2, %v238_v47 }
 0x396   :  { %v239_v50 = vpack.c.bf16 %v237_v49, %v237_v49 }
 0x398   :  { %405 = vmatmul.mubr.msk.bf16.vlgmr.msra.gmra.mrb[8].mxu0 %vm215_vm2, %v239_v50 }
 0x467   :  { %v283_v51 = vpop.f32.mrb[4].mxu1 }
 0x468   :  { %337 = vst.msk [vmem:[#allocation7] sm:$0xff] %vm70_vm1, %v283_v51  ;;  %v400_v52 = vpop.f32.mrb[5].mxu1 }
 0x469   :  { %v286_v53 = vpop.f32.mrb[6].mxu1 }
 0x46a   :  { %v401_v54 = vpop.f32.mrb[7].mxu1 }
 0x46b   :  { %v331_v55 = vpop.f32.mrb[8].mxu0 }
 0x46c   :  { %338 = vst.msk [vmem:[#allocation7 + $0x8] sm:$0xff] %vm70_vm1, %v331_v55  ;;  %v406_v56 = vpop.f32.mrb[9].mxu0 }
 0x46d   :  { %v334_v57 = vpop.f32.mrb[10].mxu0 }
 0x46e   :  { %483 = shalt.err (!%p480_p6)
}
 0x46f   :  { %s484_s18 = scalar_lea.hbm %s602_s3, 256 }
 0x470   :  { %p485_p7 = scmp.ne.s32.totalorder %s602_s3, %s484_s18  ;;  %p488_p8 = scmp.lt.u32.totalorder %s484_s18, %s602_s3 }
 0x472   :  { %p490_p9 = pnand %p488_p8, %p485_p7 }
 0x474   :  { %493 = shalt.err (!%p490_p9)
}
 0x475   :  { %350 = dma.vmem_to_hbm [thread:$0]  %s345_s14, 256, %s602_s3, [#allocation4], %s501_s22, %s501_s22, %s502_s23   ;;  %v407_v58 = vpop.f32.mrb[11].mxu0 }
 0x476   :  { %498 = dma.done.wait [#allocation4], 256  }
 0x477   :  { %499 = vsyncadd [#allocation4], 4294967040 }
 0x478   :  { %354 = vsyncpa [#allocation3], 1 }
 0x479   :  { %355 = vsyncpa [#allocation6], 1 }
 0x47a   :  { %356 = vsyncpa [#allocation4], 1 }

</bundles_post_ra>
